<compile_context>
chip_gen: v7x
topology: tpu7x:2x2x1
jax: 0.10.0
libtpu: 0.0.40
codegen_flags: <defaults>
</compile_context>

<pallas_src>
import jax
import jax.numpy as jnp
from jax.experimental import pallas as pl
from jax.experimental.pallas import tpu as pltpu


def _round_up(n, m):
    return ((n + m - 1) // m) * m


def _fused_fc_kernel(wbig_ref, bias_ref, x_ref, o_ref):
    # wbig_ref: (HW, HW)      lifted weight, kron(W_fc.T, I_W)
    # bias_ref: (1, HW)       lifted bias row, repeat(b_fc, W)
    # x_ref:    (TILE_N, HW)  tile of flattened input rows (one row per (b,c))
    # o_ref:    (TILE_N, HW)  matching output tile
    y = jnp.dot(x_ref[...], wbig_ref[...], preferred_element_type=jnp.float32)
    o_ref[...] = (y + bias_ref[...]).astype(o_ref.dtype)


def single_layer_model_with_transposes(x, w_fc, b_fc, *, tile_n_max=2048):
    """x: (B, C, 10, W) float32; w_fc: (10, 10); b_fc: (10,). Returns (B, C, 10, W)."""
    B, C, H, W = x.shape
    assert H == w_fc.shape[0] == w_fc.shape[1] == b_fc.shape[0]
    HW = H * W
    N = B * C

    # --- wrapper-side prep (cheap, one-time XLA ops) -------------------------
    # Flatten (B,C,H,W) -> (N, H*W): a contiguous reshape (free, no transpose).
    x_flat = x.reshape(N, HW)

    # Lifted weight / bias:  y_flat = x_flat @ kron(W_fc.T, I_W) + repeat(b, W)
    w_big_t = jnp.kron(w_fc.T, jnp.eye(W, dtype=w_fc.dtype))      # (HW, HW)
    bias_big = jnp.repeat(b_fc, W).reshape(1, HW)                  # (1, HW)

    # Row tiling: TILE_N rows per grid step.  Sublane dim must be a multiple
    # of 8 (or equal the full dim), so round N up to 8 first.  tile_n_max=2048
    # keeps double-buffered in+out f32 tiles (lanes padded to the next vreg
    # multiple) at ~8 MiB total -> comfortably inside the default scoped-VMEM
    # limit on every generation, including v7x's smaller 64 MiB VMEM.
    tile_n = min(tile_n_max, _round_up(N, 8))
    n_pad = _round_up(N, tile_n)
    if n_pad != N:
        x_flat = jnp.pad(x_flat, ((0, n_pad - N), (0, 0)))
    num_tiles = n_pad // tile_n

    cost = pl.CostEstimate(
        flops=2 * n_pad * HW * HW,
        transcendentals=0,
        bytes_accessed=4 * (2 * n_pad * HW + HW * HW + HW),
    )

    out_flat = pl.pallas_call(
        _fused_fc_kernel,
        out_shape=jax.ShapeDtypeStruct((n_pad, HW), x.dtype),
        grid_spec=pltpu.PrefetchScalarGridSpec(
            num_scalar_prefetch=0,
            grid=(num_tiles,),
            in_specs=[
                pl.BlockSpec((HW, HW), lambda i: (0, 0)),       # lifted weight (resident)
                pl.BlockSpec((1, HW), lambda i: (0, 0)),        # bias row (resident)
                pl.BlockSpec((tile_n, HW), lambda i: (i, 0)),   # x tile
            ],
            out_specs=pl.BlockSpec((tile_n, HW), lambda i: (i, 0)),
        ),
        compiler_params=pltpu.CompilerParams(
            dimension_semantics=("parallel",)),
        cost_estimate=cost,
    )(w_big_t, bias_big, x_flat)

    return out_flat[:N].reshape(B, C, H, W)


def _reference(x, w_fc, b_fc):
    # Pure-JAX reference mirroring the PyTorch forward exactly.
    xt = jnp.transpose(x, (0, 1, 3, 2))               # (B,C,W,10)
    y = jnp.einsum("bcwh,oh->bcwo", xt, w_fc) + b_fc  # Linear on last dim
    return jnp.transpose(y, (0, 1, 3, 2))             # (B,C,10,W)


if __name__ == "__main__":
    key = jax.random.PRNGKey(0)
    kx, kw, kb = jax.random.split(key, 3)

    B, C, H, W = 2, 4, 10, 16                          # H must be 10 (Linear(10,10))
    x = jax.random.normal(kx, (B, C, H, W), dtype=jnp.float32)
    # Deterministic parameter init (uniform, roughly torch's default range).
    bound = 1.0 / (H ** 0.5)
    w_fc = jax.random.uniform(kw, (H, H), minval=-bound, maxval=bound,
                              dtype=jnp.float32)
    b_fc = jax.random.uniform(kb, (H,), minval=-bound, maxval=bound,
                              dtype=jnp.float32)

    out = single_layer_model_with_transposes(x, w_fc, b_fc)
    out = jax.block_until_ready(out)

    ref = _reference(x, w_fc, b_fc)
    assert out.shape == (B, C, H, W)
    assert jnp.allclose(out, ref, atol=1e-5, rtol=1e-5), "mismatch vs reference"
    print("KERNEL_OK")
</pallas_src>

<mosaic_0001>
module attributes {stable_mosaic.version = 11 : i64} {
  func.func @_fused_fc_kernel(%arg0: i32, %arg1: memref<160x160xf32, #tpu.memory_space<vmem>>, %arg2: memref<1x160xf32, #tpu.memory_space<vmem>>, %arg3: memref<8x160xf32, #tpu.memory_space<vmem>>, %arg4: memref<8x160xf32, #tpu.memory_space<vmem>>) attributes {dimension_semantics = [#tpu.dimension_semantics<parallel>], iteration_bounds = array<i64: 1>, scalar_prefetch = 0 : i64, scratch_operands = 0 : i64, tpu.core_type = #tpu.core_type<tc>, window_params = [{pipeline_mode = #tpu.pipeline_mode<synchronous>, transform_indices = @transform_0, window_bounds = array<i64: 160, 160>}, {pipeline_mode = #tpu.pipeline_mode<synchronous>, transform_indices = @transform_1, window_bounds = array<i64: 1, 160>}, {transform_indices = @transform_2, window_bounds = array<i64: 8, 160>}, {transform_indices = @transform_3, window_bounds = array<i64: 8, 160>}]} {
    %c0 = arith.constant 0 : index
    %c0_0 = arith.constant 0 : index
    %0 = vector.load %arg3[%c0, %c0_0] : memref<8x160xf32, #tpu.memory_space<vmem>>, vector<8x160xf32>
    %c0_1 = arith.constant 0 : index
    %c0_2 = arith.constant 0 : index
    %1 = vector.load %arg1[%c0_1, %c0_2] : memref<160x160xf32, #tpu.memory_space<vmem>>, vector<160x160xf32>
    %cst = arith.constant dense<0.000000e+00> : vector<8x160xf32>
    %2 = tpu.matmul %0, %1, %cst {dimension_numbers = #tpu.dot_dimension_numbers<[1], [0], [0], [1], [0, 0, 1, 1], [], []>} : vector<8x160xf32>, vector<160x160xf32>, vector<8x160xf32> -> vector<8x160xf32>
    %c0_3 = arith.constant 0 : index
    %c0_4 = arith.constant 0 : index
    %3 = vector.load %arg2[%c0_3, %c0_4] : memref<1x160xf32, #tpu.memory_space<vmem>>, vector<1x160xf32>
    %4 = vector.broadcast %3 : vector<1x160xf32> to vector<8x160xf32>
    %5 = arith.addf %2, %4 : vector<8x160xf32>
    %c0_5 = arith.constant 0 : index
    %c0_6 = arith.constant 0 : index
    %6 = vector.load %arg4[%c0_5, %c0_6] : memref<8x160xf32, #tpu.memory_space<vmem>>, vector<8x160xf32>
    tpu.vector_store %arg4[%c0_5, %c0_6], %5 {strides = array<i32>} : memref<8x160xf32, #tpu.memory_space<vmem>>, vector<8x160xf32>,
    return
  }
  func.func @transform_0(%arg0: i32) -> (i32, i32) {
    %c0_i32 = arith.constant 0 : i32
    %c0_i32_0 = arith.constant 0 : i32
    %c0_i32_1 = arith.constant 0 : i32
    return %c0_i32, %c0_i32_0 : i32, i32
  }
  func.func @transform_1(%arg0: i32) -> (i32, i32) {
    %c0_i32 = arith.constant 0 : i32
    %c0_i32_0 = arith.constant 0 : i32
    %c0_i32_1 = arith.constant 0 : i32
    return %c0_i32, %c0_i32_0 : i32, i32
  }
  func.func @transform_2(%arg0: i32) -> (i32, i32) {
    %c0_i32 = arith.constant 0 : i32
    %c0_i32_0 = arith.constant 0 : i32
    return %arg0, %c0_i32 : i32, i32
  }
  func.func @transform_3(%arg0: i32) -> (i32, i32) {
    %c0_i32 = arith.constant 0 : i32
    %c0_i32_0 = arith.constant 0 : i32
    return %arg0, %c0_i32 : i32, i32
  }
}

</mosaic_0001>

<bundles_post_ra>
// kernel: tpu_custom_call.1
= control target key start
LH: loop header
LB: loop body
LE: loop exit
PB: predicated region body
PF: predicated region fallthrough
CT: control target
= control target key end

     0   :  { %8 = vsyncpa [#allocation3], 0  ;;  %s372_s0 = inlined_call_operand.hbm [shape: f32[160,160], index: 0, kind: input, shape index: {}]   ;;  %s373_s1 = inlined_call_operand.vmem [shape: f32[1,160], index: 1, kind: input, shape index: {}]   ;;  %s374_s2 = inlined_call_operand.hbm [shape: f32[8,160], index: 2, kind: input, shape index: {}]   ;;  %s375_s3 = inlined_call_operand.hbm [shape: f32[8,160], index: 3, kind: output, shape index: {}]  }
   0x1   :  { %9 = vsyncpa [#allocation6], 0 }
   0x2   :  { %10 = vsyncpa [#allocation4], 0  ;;  %s306_s12 = smov [#allocation2]   ;;  %s234_s16 = scalar_lea.hbm %s372_s0, 5120 }
   0x3   :  { %s16_s13 = sshll.u32 %s306_s12, 4  ;;  %p235_p0 = scmp.ne.s32.totalorder %s372_s0, %s234_s16  ;;  %s17_s13 = int_to_ptr.vmem [resolvable:$true] %s16_s13 }
   0x4   :  { %p238_p1 = scmp.lt.u32.totalorder %s234_s16, %s372_s0 }
   0x6   :  { %p240_p2 = pnand %p238_p1, %p235_p0 }
   0x8   :  { %243 = shalt.err (!%p240_p2)
}
   0x9   :  { %s244_s21 = scalar_lea.vmem %s17_s13, 5120  ;;  %p249_p4 = scmp.lt.s32.totalorder %s17_s13, %s17_s13 }
   0xa   :  { %p245_p3 = scmp.ne.s32.totalorder %s17_s13, %s244_s21  ;;  %p250_p5 = scmp.lt.s32.totalorder %s244_s21, %s244_s21 }
   0xc   :  { %p251_p6 = por %p250_p5, %p249_p4 }
   0xe   :  { %p252_p7 = pnand %p251_p6, %p245_p3 }
  0x10   :  { %255 = shalt.err (!%p252_p7)
}
  0x11   :  { %s307_s22 = smov 256   ;;  %s308_s23 = smov 16  }
  0x12   :  { %22 = dma.hbm_to_vmem [thread:$0]  %s372_s0, 5120, %s17_s13, [#allocation3], %s307_s22, %s307_s22, %s308_s23  }
  0x13   :  { %s309_s26 = smov [#allocation5]   ;;  %s256_s30 = scalar_lea.hbm %s374_s2, 256 }
  0x14   :  { %s31_s27 = sshll.u32 %s309_s26, 4  ;;  %p257_p8 = scmp.ne.s32.totalorder %s374_s2, %s256_s30  ;;  %s32_s27 = int_to_ptr.vmem [resolvable:$true] %s31_s27 }
  0x15   :  { %p260_p9 = scmp.lt.u32.totalorder %s256_s30, %s374_s2 }
  0x17   :  { %p262_p10 = pnand %p260_p9, %p257_p8 }
  0x19   :  { %265 = shalt.err (!%p262_p10)
}
  0x1a   :  { %s266_s8 = scalar_lea.vmem %s32_s27, 256  ;;  %p271_p12 = scmp.lt.s32.totalorder %s32_s27, %s32_s27 }
  0x1b   :  { %p267_p11 = scmp.ne.s32.totalorder %s32_s27, %s266_s8  ;;  %p272_p13 = scmp.lt.s32.totalorder %s266_s8, %s266_s8 }
  0x1d   :  { %p273_p0 = por %p272_p13, %p271_p12 }
  0x1f   :  { %p274_p1 = pnand %p273_p0, %p267_p11 }
  0x21   :  { %277 = shalt.err (!%p274_p1)
}
  0x22   :  { %34 = dma.hbm_to_vmem [thread:$0]  %s374_s2, 256, %s32_s27, [#allocation6]  }
  0x23   :  { %300 = dma.done.wait [#allocation3], 5120  }
  0x24   :  { %301 = vsyncadd [#allocation3], 4294962176 }
  0x25   :  { %302 = dma.done.wait [#allocation6], 256  }
  0x26   :  { %303 = vsyncadd [#allocation6], 4294967040  ;;  %v44_v0 = vld [vmem:[#allocation2 + $0x8] sm:$0xff]  ;;  %v46_v1 = vld [vmem:[#allocation2 + $0x18] sm:$0xff]  ;;  %vm95_vm0 = vcmask 261120   ;;  %v85_v62 = vlaneseq  ;;  %s310_s11 = smov [#allocation7]  }
  0x27   :  { %v43_v2 = vld [vmem:[#allocation2] sm:$0xff]  ;;  %v189_v3 = vpack.c.bf16 %v46_v1, %v44_v0  ;;  %v45_v4 = vld [vmem:[#allocation2 + $0x10] sm:$0xff]  ;;  %v48_v5 = vld [vmem:[#allocation2 + $0x28] sm:$0xff]  ;;  %s178_s12 = sshll.u32 %s310_s11, 4  ;;  %s179_s12 = int_to_ptr.vmem [resolvable:$true] %s178_s12 }
  0x28   :  { %v50_v6 = vld [vmem:[#allocation2 + $0x38] sm:$0xff]  ;;  %v191_v7 = vpack.c.bf16 %v45_v4, %v43_v2  ;;  %v47_v9 = vld [vmem:[#allocation2 + $0x20] sm:$0xff]  ;;  %v49_v10 = vld [vmem:[#allocation2 + $0x30] sm:$0xff]  ;;  %v86_v63 = vshrl.u32 %v85_v62, 7  ;;  %s278_s13 = scalar_lea.vmem %s179_s12, 256  ;;  %p283_p3 = scmp.lt.s32.totalorder %s179_s12, %s179_s12 }
  0x29   :  { %v193_v8 = vpack.c.bf16 %v50_v6, %v48_v5  ;;  %v52_v11 = vld [vmem:[#allocation2 + $0x48] sm:$0xff]  ;;  %190 = vmatprep.subr.bf16.mxu0 %v189_v3  ;;  %v54_v12 = vld [vmem:[#allocation2 + $0x58] sm:$0xff]  ;;  %v195_v13 = vpack.c.bf16 %v49_v10, %v47_v9  ;;  %v51_v15 = vld [vmem:[#allocation2 + $0x40] sm:$0xff]  ;;  %p279_p2 = scmp.ne.s32.totalorder %s179_s12, %s278_s13  ;;  %p284_p4 = scmp.lt.s32.totalorder %s278_s13, %s278_s13 }
  0x2a   :  { %192 = vmatpush1.bf16.msra.mxu0 %v191_v7  ;;  %v197_v14 = vpack.c.bf16 %v54_v12, %v52_v11  ;;  %v53_v16 = vld [vmem:[#allocation2 + $0x50] sm:$0xff]  ;;  %v56_v17 = vld [vmem:[#allocation2 + $0x68] sm:$0xff]  ;;  %v58_v18 = vld [vmem:[#allocation2 + $0x78] sm:$0xff]  ;;  %v87_v0 = vsub.s32 0, %v86_v63  ;;  %v91_v2 = vsub.s32 1, %v86_v63 }
  0x2b   :  { %194 = vmatprep.subr.bf16.mxu0 %v193_v8  ;;  %v199_v19 = vpack.c.bf16 %v53_v16, %v51_v15  ;;  %v201_v20 = vpack.c.bf16 %v58_v18, %v56_v17  ;;  %v55_v21 = vld [vmem:[#allocation2 + $0x60] sm:$0xff]  ;;  %v57_v22 = vld [vmem:[#allocation2 + $0x70] sm:$0xff]  ;;  %v60_v23 = vld [vmem:[#allocation2 + $0x88] sm:$0xff]  ;;  %p285_p5 = por %p284_p4, %p283_p3 }
  0x2c   :  { %v62_v24 = vld [vmem:[#allocation2 + $0x98] sm:$0xff]  ;;  %v203_v25 = vpack.c.bf16 %v57_v22, %v55_v21  ;;  %v59_v27 = vld [vmem:[#allocation2 + $0x80] sm:$0xff]  ;;  %v61_v28 = vld [vmem:[#allocation2 + $0x90] sm:$0xff] }
  0x2d   :  { %v205_v26 = vpack.c.bf16 %v62_v24, %v60_v23  ;;  %v42_v29 = vld [vmem:[#allocation5 + $0x8] sm:$0xff]  ;;  %v66_v31 = vld [vmem:[#allocation2 + $0xb8] sm:$0xff]  ;;  %v207_v32 = vpack.c.bf16 %v61_v28, %v59_v27  ;;  %v63_v34 = vld [vmem:[#allocation2 + $0xa0] sm:$0xff]  ;;  %p286_p6 = pnand %p285_p5, %p279_p2 }
  0x2e   :  { %196 = vmatpush1.bf16.msra.mxu0 %v195_v13  ;;  %v64_v30 = vld [vmem:[#allocation2 + $0xa8] sm:$0xff]  ;;  %188 = vmatprep.mubr.msk.f32.mxu0 %vm95_vm0, %v42_v29  ;;  %v65_v35 = vld [vmem:[#allocation2 + $0xb0] sm:$0xff]  ;;  %v70_v37 = vld [vmem:[#allocation2 + $0xd8] sm:$0xff] }
  0x2f   :  { %198 = vmatprep.subr.bf16.mxu0 %v197_v14  ;;  %v209_v33 = vpack.c.bf16 %v66_v31, %v64_v30  ;;  %v68_v36 = vld [vmem:[#allocation2 + $0xc8] sm:$0xff]  ;;  %v211_v38 = vpack.c.bf16 %v65_v35, %v63_v34  ;;  %v67_v40 = vld [vmem:[#allocation2 + $0xc0] sm:$0xff]  ;;  %v69_v41 = vld [vmem:[#allocation2 + $0xd0] sm:$0xff] }
  0x30   :  { %v213_v39 = vpack.c.bf16 %v70_v37, %v68_v36  ;;  %v72_v42 = vld [vmem:[#allocation2 + $0xe8] sm:$0xff]  ;;  %v74_v43 = vld [vmem:[#allocation2 + $0xf8] sm:$0xff]  ;;  %v215_v44 = vpack.c.bf16 %v69_v41, %v67_v40  ;;  %v71_v46 = vld [vmem:[#allocation2 + $0xe0] sm:$0xff] }
  0x31   :  { %v217_v45 = vpack.c.bf16 %v74_v43, %v72_v42  ;;  %v73_v47 = vld [vmem:[#allocation2 + $0xf0] sm:$0xff]  ;;  %v76_v48 = vld [vmem:[#allocation2 + $0x108] sm:$0xff]  ;;  %v78_v49 = vld [vmem:[#allocation2 + $0x118] sm:$0xff] }
  0x32   :  { %200 = vmatpush1.bf16.msra.mxu0 %v199_v19  ;;  %v219_v50 = vpack.c.bf16 %v73_v47, %v71_v46  ;;  %v221_v51 = vpack.c.bf16 %v78_v49, %v76_v48  ;;  %v75_v52 = vld [vmem:[#allocation2 + $0x100] sm:$0xff]  ;;  %v77_v53 = vld [vmem:[#allocation2 + $0x110] sm:$0xff]  ;;  %v80_v54 = vld [vmem:[#allocation2 + $0x128] sm:$0xff] }
  0x33   :  { %202 = vmatprep.subr.bf16.mxu0 %v201_v20  ;;  %v82_v55 = vld [vmem:[#allocation2 + $0x138] sm:$0xff]  ;;  %v223_v56 = vpack.c.bf16 %v77_v53, %v75_v52  ;;  %v79_v58 = vld [vmem:[#allocation2 + $0x120] sm:$0xff]  ;;  %v81_v59 = vld [vmem:[#allocation2 + $0x130] sm:$0xff] }
  0x34   :  { %v225_v57 = vpack.c.bf16 %v82_v55, %v80_v54  ;;  %v227_v60 = vpack.c.bf16 %v81_v59, %v79_v58  ;;  %v41_v61 = vld [vmem:[#allocation5] sm:$0xff] }
  0x35   :  { %v83_v1 = vld [vmem:[%s373_s1] sm:$0x3] }
  0x36   :  { %204 = vmatpush1.bf16.msra.mxu0 %v203_v25  ;;  %v88_v3 = vrot.slane %v83_v1, %v87_v0  ;;  %v92_v4 = vrot.slane %v83_v1, %v91_v2 }
  0x37   :  { %206 = vmatprep.subr.bf16.mxu0 %v205_v26 }
  0x3a   :  { %208 = vmatpush1.bf16.msra.mxu0 %v207_v32 }
  0x3b   :  { %210 = vmatprep.subr.bf16.mxu0 %v209_v33 }
  0x3e   :  { %212 = vmatpush1.bf16.msra.mxu0 %v211_v38 }
  0x3f   :  { %214 = vmatprep.subr.bf16.mxu0 %v213_v39 }
  0x42   :  { %216 = vmatpush1.bf16.msra.mxu0 %v215_v44 }
  0x43   :  { %218 = vmatprep.subr.bf16.mxu0 %v217_v45 }
  0x46   :  { %220 = vmatpush1.bf16.msra.mxu0 %v219_v50 }
  0x47   :  { %222 = vmatprep.subr.bf16.mxu0 %v221_v51 }
  0x4a   :  { %224 = vmatpush1.bf16.msra.mxu0 %v223_v56 }
  0x4b   :  { %226 = vmatprep.subr.bf16.mxu0 %v225_v57 }
  0x4e   :  { %228 = vmatpush1.bf16.msra.mxu0 %v227_v60 }
  0x51   :  { %164 = vmatmul.mubr.f32.vlgmr.msra.gmra.mrb[0].mxu0 %v41_v61 }
 0x124   :  { %v165_v5 = vpop.f32.mrb[0].mxu0 }
 0x125   :  { %v166_v6 = vadd.f32 %v165_v5, %v88_v3  ;;  %v167_v7 = vpop.f32.mrb[1].mxu0 }
 0x126   :  { %v168_v8 = vadd.f32 %v167_v7, %v92_v4 }
 0x127   :  { %170 = vst [vmem:[#allocation7] sm:$0xff] %v166_v6 }
 0x128   :  { %171 = vst.msk [vmem:[#allocation7 + $0x8] sm:$0xff] %vm95_vm0, %v168_v8 }
 0x129   :  { %289 = shalt.err (!%p286_p6)
}
 0x12a   :  { %s290_s15 = scalar_lea.hbm %s375_s3, 256 }
 0x12b   :  { %p291_p7 = scmp.ne.s32.totalorder %s375_s3, %s290_s15  ;;  %p294_p8 = scmp.lt.u32.totalorder %s290_s15, %s375_s3 }
 0x12d   :  { %p296_p9 = pnand %p294_p8, %p291_p7 }
 0x12f   :  { %299 = shalt.err (!%p296_p9)
}
 0x130   :  { %181 = dma.vmem_to_hbm [thread:$0]  %s179_s12, 256, %s375_s3, [#allocation4]  }
 0x131   :  { %304 = dma.done.wait [#allocation4], 256  }
 0x132   :  { %305 = vsyncadd [#allocation4], 4294967040 }
 0x133   :  { %185 = vsyncpa [#allocation3], 1 }
 0x134   :  { %186 = vsyncpa [#allocation6], 1 }
 0x135   :  { %187 = vsyncpa [#allocation4], 1 }

</bundles_post_ra>
